<compile_context>
chip_gen: v6e
topology: v6e:2x2x1
jax: 0.10.0
libtpu: 0.0.40
codegen_flags: <defaults>
</compile_context>

<pallas_src>
import jax
import jax.numpy as jnp
from jax.experimental import pallas as pl
from jax.experimental.pallas import tpu as pltpu


def _round_up(x, m):
    return (x + m - 1) // m * m


def _cdiv(a, b):
    return -(-a // b)


# ----------------------------------------------------------------------------- kernels


def _time_embed_kernel_full(t_ref, w1_ref, b1_ref, w2_ref, b2_ref, o_ref):
    # t_ref:  (tm, 1)    timestep column for this batch tile
    # w1_ref: (1, Dp)    fc1 weight (transposed), resident
    # b1_ref: (1, Dp)    fc1 bias, resident
    # w2_ref: (Dp, Dp)   fc2 weight, fully VMEM-resident (read from HBM once)
    # b2_ref: (1, Dp)    fc2 bias, resident
    # o_ref:  (tm, Dp)   output tile (lane-dense full width)
    t = t_ref[...]                                      # (tm, 1) f32

    # fc1 (K == 1): broadcast FMA on the VPU, SiLU via EUP sigmoid.  Single
    # fused expression -> no extra vreg->VMEM round-trips (v5e has 1 vst slot).
    h = t * w1_ref[...] + b1_ref[...]                   # (tm, Dp) f32
    h = h * jax.nn.sigmoid(h)

    # fc2 on the MXU over the full padded hidden dim, f32 accumulation.
    o = jnp.dot(h.astype(w2_ref.dtype), w2_ref[...],
                preferred_element_type=jnp.float32) + b2_ref[...]
    o_ref[...] = (o * jax.nn.sigmoid(o)).astype(o_ref.dtype)


def _time_embed_kernel_tiled(t_ref, w1_ref, b1_ref, w2_ref, b2_ref, o_ref, h_ref):
    # Fallback path for very large Dp (w2 can't stay resident).
    # Grid: (batch tiles, column tiles); batch outer, columns inner.
    # fc1 + SiLU is computed once per batch tile into h_ref and reused for
    # every column tile of this batch tile.
    @pl.when(pl.program_id(1) == 0)
    def _():
        t = t_ref[...]                                  # (tm, 1) f32
        h = t * w1_ref[...] + b1_ref[...]               # (tm, Dp) f32
        h_ref[...] = (h * jax.nn.sigmoid(h)).astype(h_ref.dtype)

    o = jnp.dot(h_ref[...], w2_ref[...],
                preferred_element_type=jnp.float32) + b2_ref[...]
    o_ref[...] = (o * jax.nn.sigmoid(o)).astype(o_ref.dtype)


# ----------------------------------------------------------------------------- wrapper


def prepare_time_embedding_params(w1, b1, w2, b2, *, use_bf16=True):
    """Pad (once) to a lane-dense multiple of 128 and cast w2.

    Expected layouts (transposed vs PyTorch):
      w1: (1, D)   (PyTorch fc1.weight.T)
      b1: (D,) or (1, D)
      w2: (D, D)   (PyTorch fc2.weight.T)
      b2: (D,) or (1, D)

    Zero padding is exact: padded h columns are silu(0)=0 and padded w2 rows
    are 0, so valid output columns are unchanged.
    """
    w1 = jnp.asarray(w1, jnp.float32)
    D = w1.shape[-1] if w1.shape[-1] != 1 else w1.shape[0]
    w1 = w1.reshape(1, D)
    b1 = jnp.asarray(b1, jnp.float32).reshape(1, D)
    w2 = jnp.asarray(w2, jnp.float32).reshape(D, D)
    b2 = jnp.asarray(b2, jnp.float32).reshape(1, D)

    Dp = _round_up(D, 128)
    if Dp != D:
        w1 = jnp.zeros((1, Dp), jnp.float32).at[:, :D].set(w1)
        b1 = jnp.zeros((1, Dp), jnp.float32).at[:, :D].set(b1)
        w2 = jnp.zeros((Dp, Dp), jnp.float32).at[:D, :D].set(w2)
        b2 = jnp.zeros((1, Dp), jnp.float32).at[:, :D].set(b2)

    w2 = w2.astype(jnp.bfloat16 if use_bf16 else jnp.float32)
    return {"w1": w1, "b1": b1, "w2": w2, "b2": b2, "D": D, "Dp": Dp}


def time_embedding(t, params, *, tm_max=256):
    """t: (B,) or (B, 1) f32 timesteps; params from prepare_time_embedding_params.

    Returns (B, D) f32.
    """
    if t.ndim == 1:
        t = t[:, None]
    t = t.astype(jnp.float32)
    B = t.shape[0]
    D, Dp = params["D"], params["Dp"]
    w1, b1, w2, b2 = params["w1"], params["b1"], params["w2"], params["b2"]
    itemsize = jnp.dtype(w2.dtype).itemsize

    budget = 40 << 20  # working budget; final request capped at 48 MiB (v7x safe)

    # --- path selection: keep w2 fully VMEM-resident whenever it fits --------
    full_width = 2 * Dp * Dp * itemsize <= (24 << 20)
    if full_width:
        tn = Dp
        # fixed VMEM: w2 (double-buffered) + w1/b1/b2 (double-buffered)
        fixed = 2 * Dp * Dp * itemsize + 3 * 2 * Dp * 4
        # per batch row: output tile (x2 buffers) + in-kernel h temporaries
        per_row = 2 * Dp * 4 + 3 * Dp * 4 + 8
    else:
        # column tiles: prefer multiples of 256 (v6e/v7x 256x256 MXU)
        tn = next(c for c in (512, 256, 128) if Dp % c == 0)
        fixed = 2 * Dp * tn * itemsize + 2 * 2 * Dp * 4 + 2 * tn * 4
        # per batch row: h scratch + h f32 temp + output tile (x2 buffers)
        per_row = Dp * itemsize + 2 * Dp * 4 + 2 * tn * 4 + 8

    # --- batch tiling: padding never exceeds ~one tile ------------------------
    tm_cap = max(8, ((budget - fixed) // per_row) // 8 * 8)
    tm_max_eff = max(8, min(tm_max, tm_cap))
    Bp0 = _round_up(B, 8)
    n_bt = _cdiv(Bp0, tm_max_eff)
    tm = _round_up(_cdiv(Bp0, n_bt), 8)
    Bp = n_bt * tm

    tp = t if Bp == B else jnp.zeros((Bp, 1), jnp.float32).at[:B, :].set(t)

    est_vmem = fixed + tm * per_row
    vmem_limit = min(48 << 20, max(32 << 20, int(1.5 * est_vmem)))

    cost = pl.CostEstimate(
        flops=2 * Bp * Dp * Dp + 3 * Bp * Dp,
        transcendentals=2 * Bp * Dp,
        bytes_accessed=4 * Bp + 12 * Dp + Dp * Dp * itemsize + 4 * Bp * Dp,
    )

    if full_width:
        grid = (Bp // tm,)
        in_specs = [
            pl.BlockSpec((tm, 1), lambda i: (i, 0)),     # t (batch tile)
            pl.BlockSpec((1, Dp), lambda i: (0, 0)),     # w1 (resident)
            pl.BlockSpec((1, Dp), lambda i: (0, 0)),     # b1 (resident)
            pl.BlockSpec((Dp, Dp), lambda i: (0, 0)),    # w2 (resident, 1 HBM read)
            pl.BlockSpec((1, Dp), lambda i: (0, 0)),     # b2 (resident)
        ]
        out_specs = pl.BlockSpec((tm, Dp), lambda i: (i, 0))
        scratch_shapes = []
        kernel = _time_embed_kernel_full
        dims = ("parallel",)
    else:
        # Batch outer, columns inner; fc1+SiLU hoisted into scratch at j == 0,
        # so the column axis must be sequential ("arbitrary").
        grid = (Bp // tm, Dp // tn)
        in_specs = [
            pl.BlockSpec((tm, 1), lambda i, j: (i, 0)),   # t (batch tile)
            pl.BlockSpec((1, Dp), lambda i, j: (0, 0)),   # w1 (resident)
            pl.BlockSpec((1, Dp), lambda i, j: (0, 0)),   # b1 (resident)
            pl.BlockSpec((Dp, tn), lambda i, j: (0, j)),  # w2 column tile
            pl.BlockSpec((1, tn), lambda i, j: (0, j)),   # b2 column tile
        ]
        out_specs = pl.BlockSpec((tm, tn), lambda i, j: (i, j))
        scratch_shapes = [pltpu.VMEM((tm, Dp), w2.dtype)]
        kernel = _time_embed_kernel_tiled
        dims = ("parallel", "arbitrary")

    out = pl.pallas_call(
        kernel,
        out_shape=jax.ShapeDtypeStruct((Bp, Dp), jnp.float32),
        grid=grid,
        in_specs=in_specs,
        out_specs=out_specs,
        scratch_shapes=scratch_shapes,
        compiler_params=pltpu.CompilerParams(
            dimension_semantics=dims,
            vmem_limit_bytes=vmem_limit,
        ),
        cost_estimate=cost,
    )(tp, w1, b1, w2, b2)

    if Bp == B and Dp == D:
        return out
    return out[:B, :D]


def time_embedding_ref(t, w1, b1, w2, b2):
    if t.ndim == 1:
        t = t[:, None]
    h = t @ w1 + b1
    h = h * jax.nn.sigmoid(h)
    h = h @ w2 + b2
    return h * jax.nn.sigmoid(h)


if __name__ == "__main__":
    B = 8
    embed_dim = 32

    key = jax.random.PRNGKey(0)
    k_t, k_w1, k_b1, k_w2, k_b2 = jax.random.split(key, 5)

    # PyTorch shapes: fc1.weight (D,1), fc1.bias (D,), fc2.weight (D,D),
    # fc2.bias (D,); stored transposed here.
    t = jax.random.uniform(k_t, (B,), dtype=jnp.float32)
    w1 = jax.random.normal(k_w1, (1, embed_dim), dtype=jnp.float32) * 0.5
    b1 = jax.random.normal(k_b1, (1, embed_dim), dtype=jnp.float32) * 0.1
    w2 = jax.random.normal(k_w2, (embed_dim, embed_dim), dtype=jnp.float32) * 0.1
    b2 = jax.random.normal(k_b2, (1, embed_dim), dtype=jnp.float32) * 0.1

    ref = time_embedding_ref(t, w1, b1, w2, b2)

    # Exact f32 path (matches PyTorch to 1e-5).
    params_f32 = prepare_time_embedding_params(w1, b1, w2, b2, use_bf16=False)
    out_f32 = jax.block_until_ready(time_embedding(t, params_f32))
    assert out_f32.shape == (B, embed_dim)
    assert jnp.allclose(out_f32, ref, atol=1e-5, rtol=1e-5), "f32 mismatch vs reference"

    # Default bf16-weight path (f32 accumulation) — looser tolerance.
    params_bf16 = prepare_time_embedding_params(w1, b1, w2, b2)  # use_bf16=True
    out_bf16 = jax.block_until_ready(time_embedding(t, params_bf16))
    assert out_bf16.shape == (B, embed_dim)
    assert jnp.allclose(out_bf16, ref, atol=2e-2, rtol=2e-2), "bf16 mismatch vs reference"

    print("KERNEL_OK")
</pallas_src>

<mosaic_0001>
module attributes {stable_mosaic.version = 11 : i64} {
  func.func @_time_embed_kernel_full(%arg0: i32, %arg1: memref<8x1xf32, #tpu.memory_space<vmem>>, %arg2: memref<1x128xf32, #tpu.memory_space<vmem>>, %arg3: memref<1x128xf32, #tpu.memory_space<vmem>>, %arg4: memref<128x128xf32, #tpu.memory_space<vmem>>, %arg5: memref<1x128xf32, #tpu.memory_space<vmem>>, %arg6: memref<8x128xf32, #tpu.memory_space<vmem>>) attributes {dimension_semantics = [#tpu.dimension_semantics<parallel>], iteration_bounds = array<i64: 1>, scalar_prefetch = 0 : i64, scratch_operands = 0 : i64, tpu.core_type = #tpu.core_type<tc>, window_params = [{transform_indices = @transform_0, window_bounds = array<i64: 8, 1>}, {pipeline_mode = #tpu.pipeline_mode<synchronous>, transform_indices = @transform_1, window_bounds = array<i64: 1, 128>}, {pipeline_mode = #tpu.pipeline_mode<synchronous>, transform_indices = @transform_2, window_bounds = array<i64: 1, 128>}, {pipeline_mode = #tpu.pipeline_mode<synchronous>, transform_indices = @transform_3, window_bounds = array<i64: 128, 128>}, {pipeline_mode = #tpu.pipeline_mode<synchronous>, transform_indices = @transform_4, window_bounds = array<i64: 1, 128>}, {transform_indices = @transform_5, window_bounds = array<i64: 8, 128>}]} {
    %c0 = arith.constant 0 : index
    %c0_0 = arith.constant 0 : index
    %0 = vector.load %arg1[%c0, %c0_0] : memref<8x1xf32, #tpu.memory_space<vmem>>, vector<8x1xf32>
    %c0_1 = arith.constant 0 : index
    %c0_2 = arith.constant 0 : index
    %1 = vector.load %arg2[%c0_1, %c0_2] : memref<1x128xf32, #tpu.memory_space<vmem>>, vector<1x128xf32>
    %2 = vector.broadcast %0 : vector<8x1xf32> to vector<8x128xf32>
    %3 = vector.broadcast %1 : vector<1x128xf32> to vector<8x128xf32>
    %4 = arith.mulf %2, %3 : vector<8x128xf32>
    %c0_3 = arith.constant 0 : index
    %c0_4 = arith.constant 0 : index
    %5 = vector.load %arg3[%c0_3, %c0_4] : memref<1x128xf32, #tpu.memory_space<vmem>>, vector<1x128xf32>
    %6 = vector.broadcast %5 : vector<1x128xf32> to vector<8x128xf32>
    %7 = arith.addf %4, %6 : vector<8x128xf32>
    %8 = arith.negf %7 : vector<8x128xf32>
    %9 = math.exp %8 : vector<8x128xf32>
    %cst = arith.constant 1.000000e+00 : f32
    %10 = vector.broadcast %cst : f32 to vector<8x128xf32>
    %11 = arith.addf %10, %9 : vector<8x128xf32>
    %12 = arith.divf %10, %11 : vector<8x128xf32>
    %13 = arith.mulf %7, %12 : vector<8x128xf32>
    %c0_5 = arith.constant 0 : index
    %c0_6 = arith.constant 0 : index
    %14 = vector.load %arg4[%c0_5, %c0_6] : memref<128x128xf32, #tpu.memory_space<vmem>>, vector<128x128xf32>
    %cst_7 = arith.constant dense<0.000000e+00> : vector<8x128xf32>
    %15 = tpu.matmul %13, %14, %cst_7 {dimension_numbers = #tpu.dot_dimension_numbers<[1], [0], [0], [1], [0, 0, 1, 1], [], []>} : vector<8x128xf32>, vector<128x128xf32>, vector<8x128xf32> -> vector<8x128xf32>
    %c0_8 = arith.constant 0 : index
    %c0_9 = arith.constant 0 : index
    %16 = vector.load %arg5[%c0_8, %c0_9] : memref<1x128xf32, #tpu.memory_space<vmem>>, vector<1x128xf32>
    %17 = vector.broadcast %16 : vector<1x128xf32> to vector<8x128xf32>
    %18 = arith.addf %15, %17 : vector<8x128xf32>
    %19 = arith.negf %18 : vector<8x128xf32>
    %20 = math.exp %19 : vector<8x128xf32>
    %cst_10 = arith.constant 1.000000e+00 : f32
    %21 = vector.broadcast %cst_10 : f32 to vector<8x128xf32>
    %22 = arith.addf %21, %20 : vector<8x128xf32>
    %23 = arith.divf %21, %22 : vector<8x128xf32>
    %24 = arith.mulf %18, %23 : vector<8x128xf32>
    %c0_11 = arith.constant 0 : index
    %c0_12 = arith.constant 0 : index
    %25 = vector.load %arg6[%c0_11, %c0_12] : memref<8x128xf32, #tpu.memory_space<vmem>>, vector<8x128xf32>
    tpu.vector_store %arg6[%c0_11, %c0_12], %24 {strides = array<i32>} : memref<8x128xf32, #tpu.memory_space<vmem>>, vector<8x128xf32>,
    return
  }
  func.func @transform_0(%arg0: i32) -> (i32, i32) {
    %c0_i32 = arith.constant 0 : i32
    %c0_i32_0 = arith.constant 0 : i32
    return %arg0, %c0_i32 : i32, i32
  }
  func.func @transform_1(%arg0: i32) -> (i32, i32) {
    %c0_i32 = arith.constant 0 : i32
    %c0_i32_0 = arith.constant 0 : i32
    %c0_i32_1 = arith.constant 0 : i32
    return %c0_i32, %c0_i32_0 : i32, i32
  }
  func.func @transform_2(%arg0: i32) -> (i32, i32) {
    %c0_i32 = arith.constant 0 : i32
    %c0_i32_0 = arith.constant 0 : i32
    %c0_i32_1 = arith.constant 0 : i32
    return %c0_i32, %c0_i32_0 : i32, i32
  }
  func.func @transform_3(%arg0: i32) -> (i32, i32) {
    %c0_i32 = arith.constant 0 : i32
    %c0_i32_0 = arith.constant 0 : i32
    %c0_i32_1 = arith.constant 0 : i32
    return %c0_i32, %c0_i32_0 : i32, i32
  }
  func.func @transform_4(%arg0: i32) -> (i32, i32) {
    %c0_i32 = arith.constant 0 : i32
    %c0_i32_0 = arith.constant 0 : i32
    %c0_i32_1 = arith.constant 0 : i32
    return %c0_i32, %c0_i32_0 : i32, i32
  }
  func.func @transform_5(%arg0: i32) -> (i32, i32) {
    %c0_i32 = arith.constant 0 : i32
    %c0_i32_0 = arith.constant 0 : i32
    return %arg0, %c0_i32 : i32, i32
  }
}

</mosaic_0001>

<bundles_post_ra>
// kernel: tpu_custom_call.1
= control target key start
LH: loop header
LB: loop body
LE: loop exit
PB: predicated region body
PF: predicated region fallthrough
CT: control target
= control target key end

     0   :  { %10 = vsyncpa [#allocation3], 0  ;;  %s352_s0 = inlined_call_operand.vmem [shape: f32[8,1], index: 0, kind: input, shape index: {}]   ;;  %s353_s1 = inlined_call_operand.vmem [shape: f32[1,128], index: 1, kind: input, shape index: {}]   ;;  %s354_s2 = inlined_call_operand.vmem [shape: f32[1,128], index: 2, kind: input, shape index: {}]   ;;  %s355_s3 = inlined_call_operand.hbm [shape: f32[128,128], index: 3, kind: input, shape index: {}]   ;;  %s356_s4 = inlined_call_operand.vmem [shape: f32[1,128], index: 4, kind: input, shape index: {}]   ;;  %s357_s5 = inlined_call_operand.hbm [shape: f32[8,128], index: 5, kind: output, shape index: {}]  }
   0x1   :  { %11 = vsyncpa [#allocation4], 0  ;;  %s297_s18 = smov [#allocation2]  }
   0x2   :  { %s23_s19 = sshll.u32 %s297_s18, 4  ;;  %s24_s19 = int_to_ptr.vmem [resolvable:$true] %s23_s19 }
   0x3   :  { %s261_s20 = scalar_lea.vmem %s24_s19, 2048  ;;  %p266_p1 = scmp.lt.s32.totalorder %s24_s19, %s24_s19 }
   0x4   :  { %p262_p0 = scmp.ne.s32.totalorder %s24_s19, %s261_s20  ;;  %p267_p2 = scmp.lt.s32.totalorder %s261_s20, %s261_s20 }
   0x6   :  { %p268_p3 = por %p267_p2, %p266_p1 }
   0x8   :  { %p269_p4 = pnand %p268_p3, %p262_p0 }
   0xa   :  { %272 = shalt.err (!%p269_p4)
}
   0xb   :  { %s298_s21 = smov 128   ;;  %s299_s22 = smov 8  }
   0xc   :  { %29 = dma.hbm_to_vmem [thread:$0]  %s355_s3, 2048, %s24_s19, [#allocation3], %s298_s21, %s298_s21, %s299_s22  }
   0xd   :  { %293 = dma.done.wait [#allocation3], 2048  }
   0xe   :  { %294 = vsyncadd [#allocation3], 4294965248  ;;  %v300_v0 = vmov 0   ;;  %v35_v1 = vld [vmem:[%s352_s0] sm:$0xff]  ;;  %v301_v2 = vmov 0.0   ;;  %v79_v3 = vld [vmem:[#allocation2 + $0x78] sm:$0xff] }
   0xf   :  { %244 = vset.pattern.permute.xlu0 %v300_v0  ;;  %202 = vmatprep.subr.mxu0 %v301_v2  ;;  %v78_v4 = vld [vmem:[#allocation2 + $0x70] sm:$0xff]  ;;  %v77_v5 = vld [vmem:[#allocation2 + $0x68] sm:$0xff]  ;;  %v76_v6 = vld [vmem:[#allocation2 + $0x60] sm:$0xff]  ;;  %vm302_vm0 = vmmov 0  }
  0x10   :  { %39 = vperm.xlu0 %244, %v35_v1   ;;  %203 = vmatpush3.msra.mxu0 %v79_v3  ;;  %v75_v7 = vld [vmem:[#allocation2 + $0x58] sm:$0xff]  ;;  %v74_v8 = vld [vmem:[#allocation2 + $0x50] sm:$0xff]  ;;  %v73_v9 = vld [vmem:[#allocation2 + $0x48] sm:$0xff] }
  0x11   :  { %204 = vmatprep.subr.mxu0 %v301_v2  ;;  %v72_v10 = vld [vmem:[#allocation2 + $0x40] sm:$0xff]  ;;  %v71_v11 = vld [vmem:[#allocation2 + $0x38] sm:$0xff]  ;;  %v70_v12 = vld [vmem:[#allocation2 + $0x30] sm:$0xff]  ;;  %234 = vmatprep.mubr.msk.f32.mxu0 %vm302_vm0, %v301_v2 }
  0x12   :  { %205 = vmatpush3.msra.mxu0 %v78_v4  ;;  %v69_v13 = vld [vmem:[#allocation2 + $0x28] sm:$0xff]  ;;  %v68_v14 = vld [vmem:[#allocation2 + $0x20] sm:$0xff]  ;;  %v67_v15 = vld [vmem:[#allocation2 + $0x18] sm:$0xff] }
  0x13   :  { %206 = vmatprep.subr.mxu0 %v301_v2  ;;  %v66_v16 = vld [vmem:[#allocation2 + $0x10] sm:$0xff]  ;;  %v65_v17 = vld [vmem:[#allocation2 + $0x8] sm:$0xff]  ;;  %v64_v18 = vld [vmem:[#allocation2] sm:$0xff] }
  0x14   :  { %207 = vmatpush3.msra.mxu0 %v77_v5  ;;  %v180_v19 = vld [vmem:[%s353_s1] ss:$0 sm:$0xff]  ;;  %s303_s1 = smov [#allocation5]  }
  0x15   :  { %208 = vmatprep.subr.mxu0 %v301_v2  ;;  %v181_v20 = vld [vmem:[%s354_s2] ss:$0 sm:$0xff]  ;;  %s171_s2 = sshll.u32 %s303_s1, 4  ;;  %s172_s2 = int_to_ptr.vmem [resolvable:$true] %s171_s2 }
  0x16   :  { %209 = vmatpush3.msra.mxu0 %v76_v6  ;;  %v183_v29 = vld [vmem:[%s356_s4] ss:$0 sm:$0xff]  ;;  %s273_s6 = scalar_lea.vmem %s172_s2, 128  ;;  %p278_p6 = scmp.lt.s32.totalorder %s172_s2, %s172_s2 }
  0x17   :  { %210 = vmatprep.subr.mxu0 %v301_v2  ;;  %p274_p5 = scmp.ne.s32.totalorder %s172_s2, %s273_s6  ;;  %p279_p7 = scmp.lt.s32.totalorder %s273_s6, %s273_s6 }
  0x18   :  { %211 = vmatpush3.msra.mxu0 %v75_v7 }
  0x19   :  { %212 = vmatprep.subr.mxu0 %v301_v2  ;;  %p280_p8 = por %p279_p7, %p278_p6 }
  0x1a   :  { %213 = vmatpush3.msra.mxu0 %v74_v8 }
  0x1b   :  { %214 = vmatprep.subr.mxu0 %v301_v2  ;;  %p281_p9 = pnand %p280_p8, %p274_p5 }
  0x1c   :  { %215 = vmatpush3.msra.mxu0 %v73_v9 }
  0x1d   :  { %216 = vmatprep.subr.mxu0 %v301_v2 }
  0x1e   :  { %217 = vmatpush3.msra.mxu0 %v72_v10 }
  0x1f   :  { %218 = vmatprep.subr.mxu0 %v301_v2 }
  0x20   :  { %219 = vmatpush3.msra.mxu0 %v71_v11 }
  0x21   :  { %220 = vmatprep.subr.mxu0 %v301_v2 }
  0x22   :  { %221 = vmatpush3.msra.mxu0 %v70_v12 }
  0x23   :  { %222 = vmatprep.subr.mxu0 %v301_v2 }
  0x24   :  { %223 = vmatpush3.msra.mxu0 %v69_v13 }
  0x25   :  { %224 = vmatprep.subr.mxu0 %v301_v2 }
  0x26   :  { %225 = vmatpush3.msra.mxu0 %v68_v14 }
  0x27   :  { %226 = vmatprep.subr.mxu0 %v301_v2 }
  0x28   :  { %227 = vmatpush3.msra.mxu0 %v67_v15 }
  0x29   :  { %228 = vmatprep.subr.mxu0 %v301_v2 }
  0x2a   :  { %229 = vmatpush3.msra.mxu0 %v66_v16 }
  0x2b   :  { %230 = vmatprep.subr.mxu0 %v301_v2 }
  0x2c   :  { %231 = vmatpush3.msra.mxu0 %v65_v17 }
  0x2d   :  { %232 = vmatprep.subr.mxu0 %v301_v2 }
  0x2e   :  { %233 = vmatpush3.msra.mxu0 %v64_v18 }
  0x8b   :  { %v40_v21 = vpop.permute.xlu0 %39 }
  0x8c   :  { %v48_v22 = vmul.f32 %v180_v19, %v40_v21 }
  0x8e   :  { %v56_v23 = vadd.f32 %v181_v20, %v48_v22 }
  0x90   :  { %v182_v24 = vmul.f32 -1.442695, %v56_v23 }
  0x92   :  { %245 = vpow2.f32 %v182_v24 }
  0x9f   :  { %v246_v25 = vpop.eup %245 }
  0xa0   :  { %v60_v26 = vadd.f32 1.0, %v246_v25 }
  0xa2   :  { %247 = vrcp.f32 %v60_v26 }
  0xaf   :  { %v248_v27 = vpop.eup %247 }
  0xb0   :  { %v63_v28 = vmul.f32 %v248_v27, %v56_v23 }
  0xb2   :  { %235 = vmatmul.mubr.f32.vlgmr.msra.gmra.mxu0 %v63_v28 }
 0x172   :  { %v153_v30 = vpop.f32.mrf.mxu0 }
 0x173   :  { %v154_v31 = vadd.f32 %v183_v29, %v153_v30 }
 0x174   :  { %v236_v32 = vpop.f32.mrf.mxu0 }
 0x175   :  { %v184_v33 = vmul.f32 -1.442695, %v154_v31 }
 0x177   :  { %249 = vpow2.f32 %v184_v33 }
 0x184   :  { %v250_v34 = vpop.eup %249 }
 0x185   :  { %v160_v35 = vadd.f32 1.0, %v250_v34 }
 0x187   :  { %251 = vrcp.f32 %v160_v35 }
 0x194   :  { %v252_v36 = vpop.eup %251 }
 0x195   :  { %v163_v37 = vmul.f32 %v252_v36, %v154_v31 }
 0x197   :  { %164 = vst [vmem:[#allocation5] sm:$0xff] %v163_v37 }
 0x198   :  { %284 = shalt.err (!%p281_p9)
}
 0x199   :  { %174 = dma.vmem_to_hbm [thread:$0]  %s172_s2, 128, %s357_s5, [#allocation4]  }
 0x19a   :  { %295 = dma.done.wait [#allocation4], 128  }
 0x19b   :  { %296 = vsyncadd [#allocation4], 4294967168 }
 0x19c   :  { %178 = vsyncpa [#allocation3], 1 }
 0x19d   :  { %179 = vsyncpa [#allocation4], 1 }

</bundles_post_ra>
